<compile_context>
chip_gen: v6e
topology: v6e:2x2x1
jax: 0.10.0
libtpu: 0.0.40
codegen_flags: <defaults>
</compile_context>

<pallas_src>
import functools

import jax
import jax.numpy as jnp
from jax.experimental import pallas as pl
from jax.experimental.pallas import tpu as pltpu


def _sigmoid(v):
    # exp goes to the EUP slot (its own issue slot); exact divide keeps the gate
    # numerically identical to the reference.
    return 1.0 / (1.0 + jnp.exp(-v))


def _se_kernel(x_ref, w1_ref, b1_ref, w2_ref, b2_ref, o_ref, s_ref, g_ref,
               *, images_per_step, channels):
    """Fused SqueezeExcitation for one block of `images_per_step` images.

    x_ref : (Nb*C, HW)  batch folded into sublanes, flattened spatial lane-dense
    w1_ref: (R, C)      squeeze 1x1-conv weight
    b1_ref: (R, 1)      squeeze bias
    w2_ref: (C, R)      excite 1x1-conv weight
    b2_ref: (C, 1)      excite bias
    o_ref : (Nb*C, HW)  x * sigmoid(gate), same layout as input
    s_ref : (Nb*C, 1)   f32 VMEM scratch: pooled means
    g_ref : (Nb*C, 1)   f32 VMEM scratch: per-(image, channel) gates
    """
    hw = x_ref.shape[-1]

    # --- Squeeze: one sublane-filled, lane-dense reduction over the whole block.
    #     Accumulate in f32 regardless of the input dtype (bf16-safe pooling).
    s_ref[...] = jnp.sum(x_ref[...], axis=-1, keepdims=True,
                         dtype=jnp.float32) * (1.0 / hw)                  # (Nb*C, 1)

    # --- Excitation: tiny channel-mixing MLP per image (negligible compute;
    #     the step cost is dominated by the pooled reduce + gating multiply).
    w1 = w1_ref[...]
    b1 = b1_ref[...]
    w2 = w2_ref[...]
    b2 = b2_ref[...]
    for b in range(images_per_step):                  # static unroll, Nb is small
        lo = b * channels
        sb = s_ref[lo:lo + channels, :]                                   # (C, 1)
        h = jnp.dot(w1, sb, preferred_element_type=jnp.float32) + b1      # (R, 1)
        h = h * _sigmoid(h)                                               # SiLU
        gb = _sigmoid(jnp.dot(w2, h, preferred_element_type=jnp.float32) + b2)
        g_ref[lo:lo + channels, :] = gb                                   # (C, 1)

    # --- Scale: re-read x (keeps live ranges short), broadcast the per-row gate
    #     along lanes, multiply in the input dtype (bf16 stays bf16 on v6e/v7x;
    #     f32 inputs stay f32), full-sublane lane-dense store.
    o_ref[...] = x_ref[...] * g_ref[...].astype(o_ref.dtype)


def _pick_images_per_step(n, c, hw, itemsize, max_block_bytes=1 << 20):
    """Images per grid step Nb such that:
      * Nb divides N,
      * the block's sublane dim (Nb*C) is a multiple of 8 (or covers the full
        N*C rows, which is always legal),
      * the block stays under ~1 MiB (so in+out double buffering is ~4 MiB,
        comfortably inside v7x's 32 MiB scoped VMEM default),
      * and, when possible, at least 2 grid steps remain (both v7x TensorCores).
    """
    divisors = [d for d in range(1, n + 1) if n % d == 0]
    aligned = [d for d in divisors if (d * c) % 8 == 0] or [n]
    under_cap = [d for d in aligned if d * c * hw * itemsize <= max_block_bytes] \
        or [min(aligned)]
    multi_step = [d for d in under_cap if n // d >= 2]
    return max(multi_step or under_cap)


def squeeze_excitation_forward(x_nchw, params):
    """x_nchw: (N, C, H, W) PyTorch-style input; returns (N, C, H, W)."""
    N, C, H, W = x_nchw.shape
    R = params["w1"].shape[0]
    HW = H * W

    # Glue: extract matmul-shaped 1x1-conv weights (no transposes of x needed).
    w1 = params["w1"][:, :, 0, 0]          # (R, C)
    b1 = params["b1"][:, None]             # (R, 1)
    w2 = params["w2"][:, :, 0, 0]          # (C, R)
    b2 = params["b2"][:, None]             # (C, 1)

    # Free reshape: fold batch into the sublane dim, keep HW lane-dense.
    # (HW = 256 here is a multiple of 128; for SE blocks where HW is not a
    #  128-multiple but C is, one would instead present (HW, C)-major blocks.)
    xf = x_nchw.reshape(N * C, HW)

    nb = _pick_images_per_step(N, C, HW, x_nchw.dtype.itemsize)
    bc = nb * C

    kernel = functools.partial(_se_kernel, images_per_step=nb, channels=C)

    of = pl.pallas_call(
        kernel,
        out_shape=jax.ShapeDtypeStruct((N * C, HW), x_nchw.dtype),
        grid=(N // nb,),
        in_specs=[
            pl.BlockSpec((bc, HW), lambda n: (n, 0)),
            pl.BlockSpec((R, C), lambda n: (0, 0)),
            pl.BlockSpec((R, 1), lambda n: (0, 0)),
            pl.BlockSpec((C, R), lambda n: (0, 0)),
            pl.BlockSpec((C, 1), lambda n: (0, 0)),
        ],
        out_specs=pl.BlockSpec((bc, HW), lambda n: (n, 0)),
        scratch_shapes=[
            pltpu.VMEM((bc, 1), jnp.float32),   # pooled means
            pltpu.VMEM((bc, 1), jnp.float32),   # gates
        ],
        compiler_params=pltpu.CompilerParams(dimension_semantics=("parallel",)),
        # input_output_aliases={0: 0} would reuse x's HBM buffer if the caller
        # no longer needs x; left off because the demo reuses x afterwards.
    )(xf, w1, b1, w2, b2)

    return of.reshape(N, C, H, W)


def squeeze_excitation_reference(x, params):
    """Pure-JAX reference matching the PyTorch module."""
    w1 = params["w1"][:, :, 0, 0]
    b1 = params["b1"]
    w2 = params["w2"][:, :, 0, 0]
    b2 = params["b2"]
    s = jnp.mean(x, axis=(2, 3))                       # AdaptiveAvgPool2d(1)
    h = s @ w1.T + b1                                  # Conv2d(C->R, 1x1)
    h = h * jax.nn.sigmoid(h)                          # SiLU
    g = jax.nn.sigmoid(h @ w2.T + b2)                  # Conv2d(R->C, 1x1) + Sigmoid
    return x * g[:, :, None, None]


if __name__ == "__main__":
    N, C, H, W = 2, 4, 16, 16
    R = 2   # reduced_dim

    key = jax.random.PRNGKey(0)
    keys = jax.random.split(key, 5)
    x = jax.random.normal(keys[0], (N, C, H, W), jnp.float32)

    def uinit(k, shape, fan_in):
        bound = 1.0 / jnp.sqrt(float(fan_in))
        return jax.random.uniform(k, shape, jnp.float32, -bound, bound)

    params = {
        "w1": uinit(keys[1], (R, C, 1, 1), C),   # Conv2d(in_channels, reduced_dim, 1)
        "b1": uinit(keys[2], (R,), C),
        "w2": uinit(keys[3], (C, R, 1, 1), R),   # Conv2d(reduced_dim, in_channels, 1)
        "b2": uinit(keys[4], (C,), R),
    }

    out = jax.jit(squeeze_excitation_forward)(x, params)
    out = jax.block_until_ready(out)

    ref = squeeze_excitation_reference(x, params)
    assert out.shape == (N, C, H, W), out.shape
    max_err = float(jnp.max(jnp.abs(out - ref)))
    assert jnp.allclose(out, ref, atol=1e-4, rtol=1e-4), f"max_err={max_err}"
    print("KERNEL_OK")
</pallas_src>

<mosaic_0001>
module attributes {stable_mosaic.version = 11 : i64} {
  func.func @_se_kernel(%arg0: i32, %arg1: memref<8x256xf32, #tpu.memory_space<vmem>>, %arg2: memref<2x4xf32, #tpu.memory_space<vmem>>, %arg3: memref<2x1xf32, #tpu.memory_space<vmem>>, %arg4: memref<4x2xf32, #tpu.memory_space<vmem>>, %arg5: memref<4x1xf32, #tpu.memory_space<vmem>>, %arg6: memref<8x256xf32, #tpu.memory_space<vmem>>, %arg7: memref<8x1xf32, #tpu.memory_space<vmem>>, %arg8: memref<8x1xf32, #tpu.memory_space<vmem>>) attributes {dimension_semantics = [#tpu.dimension_semantics<parallel>], iteration_bounds = array<i64: 1>, scalar_prefetch = 0 : i64, scratch_operands = 2 : i64, tpu.core_type = #tpu.core_type<tc>, window_params = [{transform_indices = @transform_0, window_bounds = array<i64: 8, 256>}, {pipeline_mode = #tpu.pipeline_mode<synchronous>, transform_indices = @transform_1, window_bounds = array<i64: 2, 4>}, {pipeline_mode = #tpu.pipeline_mode<synchronous>, transform_indices = @transform_2, window_bounds = array<i64: 2, 1>}, {pipeline_mode = #tpu.pipeline_mode<synchronous>, transform_indices = @transform_3, window_bounds = array<i64: 4, 2>}, {pipeline_mode = #tpu.pipeline_mode<synchronous>, transform_indices = @transform_4, window_bounds = array<i64: 4, 1>}, {transform_indices = @transform_5, window_bounds = array<i64: 8, 256>}]} {
    %c0 = arith.constant 0 : index
    %c0_0 = arith.constant 0 : index
    %0 = vector.load %arg1[%c0, %c0_0] : memref<8x256xf32, #tpu.memory_space<vmem>>, vector<8x256xf32>
    %cst = arith.constant dense<0.000000e+00> : vector<8xf32>
    %1 = vector.multi_reduction <add>, %0, %cst [1] : vector<8x256xf32> to vector<8xf32>
    %2 = vector.shape_cast %1 : vector<8xf32> to vector<8x1xf32>
    %cst_1 = arith.constant 3.906250e-03 : f32
    %3 = vector.broadcast %cst_1 : f32 to vector<8x1xf32>
    %4 = arith.mulf %2, %3 : vector<8x1xf32>
    %c0_2 = arith.constant 0 : index
    %c0_3 = arith.constant 0 : index
    %5 = vector.load %arg7[%c0_2, %c0_3] : memref<8x1xf32, #tpu.memory_space<vmem>>, vector<8x1xf32>
    tpu.vector_store %arg7[%c0_2, %c0_3], %4 {strides = array<i32>} : memref<8x1xf32, #tpu.memory_space<vmem>>, vector<8x1xf32>,
    %c0_4 = arith.constant 0 : index
    %c0_5 = arith.constant 0 : index
    %6 = vector.load %arg2[%c0_4, %c0_5] : memref<2x4xf32, #tpu.memory_space<vmem>>, vector<2x4xf32>
    %c0_6 = arith.constant 0 : index
    %c0_7 = arith.constant 0 : index
    %7 = vector.load %arg3[%c0_6, %c0_7] : memref<2x1xf32, #tpu.memory_space<vmem>>, vector<2x1xf32>
    %c0_8 = arith.constant 0 : index
    %c0_9 = arith.constant 0 : index
    %8 = vector.load %arg4[%c0_8, %c0_9] : memref<4x2xf32, #tpu.memory_space<vmem>>, vector<4x2xf32>
    %c0_10 = arith.constant 0 : index
    %c0_11 = arith.constant 0 : index
    %9 = vector.load %arg5[%c0_10, %c0_11] : memref<4x1xf32, #tpu.memory_space<vmem>>, vector<4x1xf32>
    %c0_12 = arith.constant 0 : index
    %c0_13 = arith.constant 0 : index
    %10 = vector.load %arg7[%c0_12, %c0_13] : memref<8x1xf32, #tpu.memory_space<vmem>>, vector<4x1xf32>
    %cst_14 = arith.constant dense<0.000000e+00> : vector<2x1xf32>
    %11 = tpu.matmul %6, %10, %cst_14 {dimension_numbers = #tpu.dot_dimension_numbers<[1], [0], [0], [1], [0, 0, 1, 1], [], []>} : vector<2x4xf32>, vector<4x1xf32>, vector<2x1xf32> -> vector<2x1xf32>
    %12 = arith.addf %11, %7 : vector<2x1xf32>
    %cst_15 = arith.constant 0.000000e+00 : f32
    %13 = vector.broadcast %cst_15 : f32 to vector<2x1xf32>
    %14 = arith.subf %13, %12 : vector<2x1xf32>
    %15 = math.exp %14 : vector<2x1xf32>
    %cst_16 = arith.constant 1.000000e+00 : f32
    %16 = vector.broadcast %cst_16 : f32 to vector<2x1xf32>
    %17 = arith.addf %16, %15 : vector<2x1xf32>
    %cst_17 = arith.constant 1.000000e+00 : f32
    %18 = vector.broadcast %cst_17 : f32 to vector<2x1xf32>
    %19 = arith.divf %18, %17 : vector<2x1xf32>
    %20 = arith.mulf %12, %19 : vector<2x1xf32>
    %cst_18 = arith.constant dense<0.000000e+00> : vector<4x1xf32>
    %21 = tpu.matmul %8, %20, %cst_18 {dimension_numbers = #tpu.dot_dimension_numbers<[1], [0], [0], [1], [0, 0, 1, 1], [], []>} : vector<4x2xf32>, vector<2x1xf32>, vector<4x1xf32> -> vector<4x1xf32>
    %22 = arith.addf %21, %9 : vector<4x1xf32>
    %cst_19 = arith.constant 0.000000e+00 : f32
    %23 = vector.broadcast %cst_19 : f32 to vector<4x1xf32>
    %24 = arith.subf %23, %22 : vector<4x1xf32>
    %25 = math.exp %24 : vector<4x1xf32>
    %cst_20 = arith.constant 1.000000e+00 : f32
    %26 = vector.broadcast %cst_20 : f32 to vector<4x1xf32>
    %27 = arith.addf %26, %25 : vector<4x1xf32>
    %cst_21 = arith.constant 1.000000e+00 : f32
    %28 = vector.broadcast %cst_21 : f32 to vector<4x1xf32>
    %29 = arith.divf %28, %27 : vector<4x1xf32>
    %c0_22 = arith.constant 0 : index
    %c0_23 = arith.constant 0 : index
    %30 = vector.load %arg8[%c0_22, %c0_23] : memref<8x1xf32, #tpu.memory_space<vmem>>, vector<4x1xf32>
    tpu.vector_store %arg8[%c0_22, %c0_23], %29 {strides = array<i32>} : memref<8x1xf32, #tpu.memory_space<vmem>>, vector<4x1xf32>,
    %c4 = arith.constant 4 : index
    %c0_24 = arith.constant 0 : index
    %31 = vector.load %arg7[%c4, %c0_24] : memref<8x1xf32, #tpu.memory_space<vmem>>, vector<4x1xf32>
    %cst_25 = arith.constant dense<0.000000e+00> : vector<2x1xf32>
    %32 = tpu.matmul %6, %31, %cst_25 {dimension_numbers = #tpu.dot_dimension_numbers<[1], [0], [0], [1], [0, 0, 1, 1], [], []>} : vector<2x4xf32>, vector<4x1xf32>, vector<2x1xf32> -> vector<2x1xf32>
    %33 = arith.addf %32, %7 : vector<2x1xf32>
    %cst_26 = arith.constant 0.000000e+00 : f32
    %34 = vector.broadcast %cst_26 : f32 to vector<2x1xf32>
    %35 = arith.subf %34, %33 : vector<2x1xf32>
    %36 = math.exp %35 : vector<2x1xf32>
    %cst_27 = arith.constant 1.000000e+00 : f32
    %37 = vector.broadcast %cst_27 : f32 to vector<2x1xf32>
    %38 = arith.addf %37, %36 : vector<2x1xf32>
    %cst_28 = arith.constant 1.000000e+00 : f32
    %39 = vector.broadcast %cst_28 : f32 to vector<2x1xf32>
    %40 = arith.divf %39, %38 : vector<2x1xf32>
    %41 = arith.mulf %33, %40 : vector<2x1xf32>
    %cst_29 = arith.constant dense<0.000000e+00> : vector<4x1xf32>
    %42 = tpu.matmul %8, %41, %cst_29 {dimension_numbers = #tpu.dot_dimension_numbers<[1], [0], [0], [1], [0, 0, 1, 1], [], []>} : vector<4x2xf32>, vector<2x1xf32>, vector<4x1xf32> -> vector<4x1xf32>
    %43 = arith.addf %42, %9 : vector<4x1xf32>
    %cst_30 = arith.constant 0.000000e+00 : f32
    %44 = vector.broadcast %cst_30 : f32 to vector<4x1xf32>
    %45 = arith.subf %44, %43 : vector<4x1xf32>
    %46 = math.exp %45 : vector<4x1xf32>
    %cst_31 = arith.constant 1.000000e+00 : f32
    %47 = vector.broadcast %cst_31 : f32 to vector<4x1xf32>
    %48 = arith.addf %47, %46 : vector<4x1xf32>
    %cst_32 = arith.constant 1.000000e+00 : f32
    %49 = vector.broadcast %cst_32 : f32 to vector<4x1xf32>
    %50 = arith.divf %49, %48 : vector<4x1xf32>
    %c4_33 = arith.constant 4 : index
    %c0_34 = arith.constant 0 : index
    %51 = vector.load %arg8[%c4_33, %c0_34] : memref<8x1xf32, #tpu.memory_space<vmem>>, vector<4x1xf32>
    tpu.vector_store %arg8[%c4_33, %c0_34], %50 {strides = array<i32>} : memref<8x1xf32, #tpu.memory_space<vmem>>, vector<4x1xf32>,
    %c0_35 = arith.constant 0 : index
    %c0_36 = arith.constant 0 : index
    %52 = vector.load %arg1[%c0_35, %c0_36] : memref<8x256xf32, #tpu.memory_space<vmem>>, vector<8x256xf32>
    %c0_37 = arith.constant 0 : index
    %c0_38 = arith.constant 0 : index
    %53 = vector.load %arg8[%c0_37, %c0_38] : memref<8x1xf32, #tpu.memory_space<vmem>>, vector<8x1xf32>
    %54 = vector.broadcast %53 : vector<8x1xf32> to vector<8x256xf32>
    %55 = arith.mulf %52, %54 : vector<8x256xf32>
    %c0_39 = arith.constant 0 : index
    %c0_40 = arith.constant 0 : index
    %56 = vector.load %arg6[%c0_39, %c0_40] : memref<8x256xf32, #tpu.memory_space<vmem>>, vector<8x256xf32>
    tpu.vector_store %arg6[%c0_39, %c0_40], %55 {strides = array<i32>} : memref<8x256xf32, #tpu.memory_space<vmem>>, vector<8x256xf32>,
    return
  }
  func.func @transform_0(%arg0: i32) -> (i32, i32) {
    %c0_i32 = arith.constant 0 : i32
    %c0_i32_0 = arith.constant 0 : i32
    return %arg0, %c0_i32 : i32, i32
  }
  func.func @transform_1(%arg0: i32) -> (i32, i32) {
    %c0_i32 = arith.constant 0 : i32
    %c0_i32_0 = arith.constant 0 : i32
    %c0_i32_1 = arith.constant 0 : i32
    return %c0_i32, %c0_i32_0 : i32, i32
  }
  func.func @transform_2(%arg0: i32) -> (i32, i32) {
    %c0_i32 = arith.constant 0 : i32
    %c0_i32_0 = arith.constant 0 : i32
    %c0_i32_1 = arith.constant 0 : i32
    return %c0_i32, %c0_i32_0 : i32, i32
  }
  func.func @transform_3(%arg0: i32) -> (i32, i32) {
    %c0_i32 = arith.constant 0 : i32
    %c0_i32_0 = arith.constant 0 : i32
    %c0_i32_1 = arith.constant 0 : i32
    return %c0_i32, %c0_i32_0 : i32, i32
  }
  func.func @transform_4(%arg0: i32) -> (i32, i32) {
    %c0_i32 = arith.constant 0 : i32
    %c0_i32_0 = arith.constant 0 : i32
    %c0_i32_1 = arith.constant 0 : i32
    return %c0_i32, %c0_i32_0 : i32, i32
  }
  func.func @transform_5(%arg0: i32) -> (i32, i32) {
    %c0_i32 = arith.constant 0 : i32
    %c0_i32_0 = arith.constant 0 : i32
    return %arg0, %c0_i32 : i32, i32
  }
}

</mosaic_0001>

<bundles_post_ra>
// kernel: squeeze_excitation_forward.1
= control target key start
LH: loop header
LB: loop body
LE: loop exit
PB: predicated region body
PF: predicated region fallthrough
CT: control target
= control target key end

     0   :  { %v437_v3 = vmov 0.0   ;;  %vm438_vm0 = vmmov 0   ;;  %vm26_vm1 = vcmask 7168   ;;  %vm37_vm2 = vcmask 1043456   ;;  %s506_s0 = inlined_call_operand.vmem [shape: f32[8,256], index: 0, kind: input, shape index: {}]   ;;  %s507_s1 = inlined_call_operand.vmem [shape: f32[2,4], index: 1, kind: input, shape index: {}]   ;;  %s508_s2 = inlined_call_operand.vmem [shape: f32[2,1], index: 2, kind: input, shape index: {}]   ;;  %s509_s3 = inlined_call_operand.vmem [shape: f32[4,2], index: 3, kind: input, shape index: {}]   ;;  %s510_s4 = inlined_call_operand.vmem [shape: f32[4,1], index: 4, kind: input, shape index: {}]   ;;  %s511_s5 = inlined_call_operand.vmem [shape: f32[8,256], index: 5, kind: output, shape index: {}]  }
   0x1   :  { %v473_v0 = vld [vmem:[%s506_s0] sm:$0xff]  ;;  %v478_v1 = vld [vmem:[%s506_s0 + $0x8] sm:$0xff]  ;;  %397 = vmatprep.subr.mxu0 %v437_v3  ;;  %402 = vmatprep.subr.mxu1 %v437_v3  ;;  %vm33_vm3 = vcmask 31744   ;;  %vm122_vm4 = vcmask 1041408   ;;  %vm118_vm5 = vcmask 15360   ;;  %v439_v29 = vmov 0  }
   0x2   :  { %v22_v2 = vadd.f32 %v478_v1, %v473_v0  ;;  %399 = vmatprep.mubr.msk.f32.mxu0 %vm438_vm0, %v437_v3  ;;  %404 = vmatprep.mubr.msk.f32.mxu1 %vm438_vm0, %v437_v3  ;;  %v28_v6 = vld [vmem:[%s507_s1] sm:$0x3]  ;;  %vm202_vm6 = vcmask 3072  }
   0x3   :  { %v29_v9 = vld [vmem:[%s508_s2] sm:$0x3]  ;;  %420 = vset.pattern.permute.xlu0 %v439_v29 }
   0x4   :  { %23 = vadd.xlane.f32.xlu0 %v22_v2  ;;  %v30_v26 = vld [vmem:[%s509_s3] sm:$0xf] }
   0x5   :  { %v31_v30 = vld [vmem:[%s510_s4] sm:$0xf] }
  0x8d   :  { %v24_v4 = vpop.xlane.xlu0 %23 }
  0x8e   :  { %v25_v5 = vmul.f32 0.00390625, %v24_v4 }
  0x90   :  { %27 = vst.msk [vmem:[#allocation2] sm:$0xff] %vm26_vm1, %v25_v5 }
  0x97   :  { %v32_v7 = vld [vmem:[#allocation2] sm:$0xf]  ;;  %v204_v8 = vld [vmem:[#allocation2 + $0x4] sm:$0xf] }
  0x98   :  { %398 = vmatpush3.msk.msra.mxu0 %vm37_vm2, %v32_v7 }
  0x99   :  { %400 = vmatmul.mubr.msk.f32.vlgmr.msra.gmra.mxu0 %vm33_vm3, %v28_v6  ;;  %407 = vmatprep.subr.mxu0 %v437_v3 }
  0x9a   :  { %408 = vmatpush3.msk.msra.mxu0 %vm37_vm2, %v204_v8  ;;  %409 = vmatprep.mubr.msk.f32.mxu0 %vm438_vm0, %v437_v3 }
  0x9d   :  { %410 = vmatmul.mubr.msk.f32.vlgmr.msra.gmra.mxu0 %vm33_vm3, %v28_v6 }
 0x159   :  { %v107_v10 = vpop.f32.mrf.mxu0 }
 0x15a   :  { %v108_v11 = vadd.f32 %v107_v10, %v29_v9 }
 0x15b   :  { %v401_v12 = vpop.f32.mrf.mxu0 }
 0x15c   :  { %v111_v13 = vsub.f32 0.0, %v108_v11 }
 0x15d   :  { %v274_v14 = vpop.f32.mrf.mxu0 }
 0x15e   :  { %v112_v15 = vmul.f32 1.442695, %v111_v13  ;;  %v275_v16 = vadd.f32 %v274_v14, %v29_v9 }
 0x15f   :  { %v411_v17 = vpop.f32.mrf.mxu0 }
 0x160   :  { %421 = vpow2.f32 %v112_v15  ;;  %v278_v18 = vsub.f32 0.0, %v275_v16 }
 0x162   :  { %v279_v19 = vmul.f32 1.442695, %v278_v18 }
 0x164   :  { %423 = vpow2.f32 %v279_v19 }
 0x16d   :  { %v422_v20 = vpop.eup %421 }
 0x16e   :  { %v114_v21 = vadd.f32 1.0, %v422_v20 }
 0x170   :  { %425 = vrcp.f32 %v114_v21 }
 0x171   :  { %v424_v22 = vpop.eup %423 }
 0x172   :  { %v281_v23 = vadd.f32 1.0, %v424_v22 }
 0x174   :  { %427 = vrcp.f32 %v281_v23 }
 0x17d   :  { %v426_v24 = vpop.eup %425 }
 0x17e   :  { %v117_v25 = vmul.f32 %v426_v24, %v108_v11 }
 0x180   :  { %403 = vmatpush3.msk.msra.mxu1 %vm122_vm4, %v117_v25 }
 0x181   :  { %v428_v27 = vpop.eup %427  ;;  %405 = vmatmul.mubr.msk.f32.vlgmr.msra.gmra.mxu1 %vm118_vm5, %v30_v26  ;;  %412 = vmatprep.subr.mxu1 %v437_v3 }
 0x182   :  { %v284_v28 = vmul.f32 %v428_v27, %v275_v16  ;;  %414 = vmatprep.mubr.msk.f32.mxu1 %vm438_vm0, %v437_v3 }
 0x184   :  { %413 = vmatpush3.msk.msra.mxu1 %vm122_vm4, %v284_v28 }
 0x185   :  { %415 = vmatmul.mubr.msk.f32.vlgmr.msra.gmra.mxu1 %vm118_vm5, %v30_v26 }
 0x241   :  { %v192_v31 = vpop.f32.mrf.mxu1 }
 0x242   :  { %v193_v32 = vadd.f32 %v192_v31, %v31_v30 }
 0x243   :  { %v406_v33 = vpop.f32.mrf.mxu1 }
 0x244   :  { %v196_v34 = vsub.f32 0.0, %v193_v32 }
 0x245   :  { %v354_v35 = vpop.f32.mrf.mxu1 }
 0x246   :  { %v197_v36 = vmul.f32 1.442695, %v196_v34  ;;  %v355_v37 = vadd.f32 %v354_v35, %v31_v30 }
 0x247   :  { %v416_v38 = vpop.f32.mrf.mxu1 }
 0x248   :  { %429 = vpow2.f32 %v197_v36  ;;  %v358_v39 = vsub.f32 0.0, %v355_v37 }
 0x24a   :  { %v359_v40 = vmul.f32 1.442695, %v358_v39 }
 0x24c   :  { %431 = vpow2.f32 %v359_v40 }
 0x255   :  { %v430_v41 = vpop.eup %429 }
 0x256   :  { %v199_v42 = vadd.f32 1.0, %v430_v41 }
 0x258   :  { %433 = vrcp.f32 %v199_v42 }
 0x259   :  { %v432_v43 = vpop.eup %431 }
 0x25a   :  { %v361_v44 = vadd.f32 1.0, %v432_v43 }
 0x25c   :  { %435 = vrcp.f32 %v361_v44 }
 0x265   :  { %v434_v45 = vpop.eup %433 }
 0x266   :  { %203 = vst.msk [vmem:[#allocation3] sm:$0xf] %vm202_vm6, %v434_v45 }
 0x269   :  { %v436_v46 = vpop.eup %435 }
 0x26a   :  { %364 = vst.msk [vmem:[#allocation3 + $0x4] sm:$0xf] %vm202_vm6, %v436_v46 }
 0x271   :  { %v367_v47 = vld [vmem:[#allocation3] sm:$0xff] }
 0x272   :  { %370 = vperm.xlu0 %420, %v367_v47  }
 0x2ed   :  { %v371_v48 = vpop.permute.xlu0 %370 }
 0x2ee   :  { %v373_v49 = vmul.f32 %v371_v48, %v473_v0  ;;  %v374_v50 = vmul.f32 %v371_v48, %v478_v1 }
 0x2f0   :  { %375 = vst [vmem:[%s511_s5] sm:$0xff] %v373_v49  ;;  %376 = vst [vmem:[%s511_s5 + $0x8] sm:$0xff] %v374_v50 }

</bundles_post_ra>
